<compile_context>
chip_gen: v6e
topology: v6e:2x2x1
jax: 0.10.0
libtpu: 0.0.40
codegen_flags: <defaults>
</compile_context>

<pallas_src>
import jax
import jax.numpy as jnp
from jax.experimental import pallas as pl
from jax.experimental.pallas import tpu as pltpu

# Deterministic "module parameters" (matching _Operation.__init__ defaults used here)
TEMPERATURE = 0.1          # self.temperature buffer
PROB_RANGE = (0.1, 0.9)    # probability_range
MAGNITUDE_SCALE = 1.0      # magnitude_scale (unused on the probability path)


def _blend_kernel(s_ref, x_ref, o_ref):
    """o = clip(x + s, 0, 1); s = mask*mag per row, broadcast along the lane axis.

    Algebraically identical to clamp(mask*(x+mag) + (1-mask)*x, 0, 1).
    """
    x = x_ref[...]                 # (TB, cols)
    s = s_ref[...]                 # (TB, 1)  -> broadcasts over lanes for free
    o_ref[...] = jnp.clip(x + s, 0.0, 1.0).astype(o_ref.dtype)


def _relaxed_bernoulli_rsample(prob, temperature, key):
    """Reparameterized RelaxedBernoulli sample (same math as torch's rsample)."""
    eps = 1e-6
    u = jax.random.uniform(key, prob.shape, minval=eps, maxval=1.0 - eps)
    logits = jnp.log(prob) - jnp.log1p(-prob)
    logistic = jnp.log(u) - jnp.log1p(-u)
    return jax.nn.sigmoid((logits + logistic) / temperature)


def operation_forward(x, mag, key):
    """Forward pass of _Operation (requires_probability=True, training=True).

    x   : (B, C, H, W) or (C, H, W), float32 in [0, 1]
    mag : (B,) per-sample value; used both as the Bernoulli probability
          (after clamping to PROB_RANGE) and as the operation magnitude.
    key : jax PRNG key for the RelaxedBernoulli rsample.
    """
    if x.ndim == 3:
        x = x[None]
        mag = jnp.atleast_1d(mag)
    assert x.ndim == 4
    B, C, H, W = x.shape
    cols = C * H * W

    # get_mask(): clamp prob to probability_range, draw relaxed-Bernoulli sample
    prob = jnp.clip(mag, PROB_RANGE[0], PROB_RANGE[1])
    mask = _relaxed_bernoulli_rsample(prob, TEMPERATURE, key)          # (B,)

    # Per-sample blend scale: mask*(x+mag) + (1-mask)*x == x + mask*mag
    s = (mask * mag).astype(jnp.float32).reshape(B, 1)

    # Lane-dense 2D slab: last dim = C*H*W (full extent / multiple of 128).
    x_flat = x.reshape(B, cols)

    # Row tiling: target ~1 MiB tiles (well within v7x's 64 MiB VMEM with
    # double buffering); whole batch in one block when it is small.
    bytes_per_row = cols * x_flat.dtype.itemsize
    tb = max(1, (1 << 20) // max(1, bytes_per_row))
    if tb >= B:
        tb = B                                # full extent -> no (8,128) constraint
    else:
        tb = max(8, (tb // 8) * 8)            # sublane-aligned row tile
    grid = (pl.cdiv(B, tb),)

    out_flat = pl.pallas_call(
        _blend_kernel,
        grid=grid,
        in_specs=[
            pl.BlockSpec((tb, 1), lambda i: (i, 0)),      # per-row blend scale (VMEM)
            pl.BlockSpec((tb, cols), lambda i: (i, 0)),   # image rows
        ],
        out_specs=pl.BlockSpec((tb, cols), lambda i: (i, 0)),
        out_shape=jax.ShapeDtypeStruct((B, cols), x_flat.dtype),
        input_output_aliases={1: 0},                      # reuse x slab buffer
        compiler_params=pltpu.CompilerParams(
            dimension_semantics=("parallel",)),
    )(s, x_flat)

    return out_flat.reshape(B, C, H, W)


def _reference_forward(x, mag, key):
    """Pure-JAX reference of the original module's blend, for correctness checking."""
    B = x.shape[0]
    prob = jnp.clip(mag, PROB_RANGE[0], PROB_RANGE[1])
    mask = _relaxed_bernoulli_rsample(prob, TEMPERATURE, key).reshape(B, 1, 1, 1)
    op_x = x + mag.reshape(B, 1, 1, 1)
    return jnp.clip(mask * op_x + (1.0 - mask) * x, 0.0, 1.0)


if __name__ == "__main__":
    key = jax.random.PRNGKey(0)
    kx, kmask = jax.random.split(key)

    B, C, H, W = 2, 4, 16, 16
    x = jax.random.uniform(kx, (B, C, H, W), dtype=jnp.float32)     # in [0, 1]
    mag = jnp.array([0.3, 0.7], dtype=jnp.float32)                  # per-sample prob/magnitude

    out = operation_forward(x, mag, kmask)
    out = jax.block_until_ready(out)

    ref = _reference_forward(x, mag, kmask)
    assert out.shape == (B, C, H, W)
    assert jnp.all(out >= 0.0) and jnp.all(out <= 1.0)
    # x + mask*mag vs mask*(x+mag)+(1-mask)*x differ only by f32 rounding (~1e-7)
    assert jnp.allclose(out, ref, atol=1e-5, rtol=1e-5)

    # TODO(synk): eval-mode hard-Bernoulli scatter path (output[mask == 1] = op(...))
    # needs data-dependent batch selection; not implemented in the kernel.
    print("KERNEL_OK")
</pallas_src>

<mosaic_0001>
module attributes {stable_mosaic.version = 11 : i64} {
  func.func @_blend_kernel(%arg0: i32, %arg1: memref<2x1xf32, #tpu.memory_space<vmem>>, %arg2: memref<2x1024xf32, #tpu.memory_space<vmem>>, %arg3: memref<2x1024xf32, #tpu.memory_space<vmem>>) attributes {dimension_semantics = [#tpu.dimension_semantics<parallel>], iteration_bounds = array<i64: 1>, scalar_prefetch = 0 : i64, scratch_operands = 0 : i64, tpu.core_type = #tpu.core_type<tc>, window_params = [{transform_indices = @transform_0, window_bounds = array<i64: 2, 1>}, {transform_indices = @transform_1, window_bounds = array<i64: 2, 1024>}, {transform_indices = @transform_2, window_bounds = array<i64: 2, 1024>}]} {
    %c0 = arith.constant 0 : index
    %c0_0 = arith.constant 0 : index
    %0 = vector.load %arg2[%c0, %c0_0] : memref<2x1024xf32, #tpu.memory_space<vmem>>, vector<2x1024xf32>
    %c0_1 = arith.constant 0 : index
    %c0_2 = arith.constant 0 : index
    %1 = vector.load %arg1[%c0_1, %c0_2] : memref<2x1xf32, #tpu.memory_space<vmem>>, vector<2x1xf32>
    %2 = vector.broadcast %1 : vector<2x1xf32> to vector<2x1024xf32>
    %3 = arith.addf %0, %2 : vector<2x1024xf32>
    %cst = arith.constant 0.000000e+00 : f32
    %cst_3 = arith.constant 1.000000e+00 : f32
    %4 = vector.broadcast %cst : f32 to vector<2x1024xf32>
    %5 = arith.maximumf %4, %3 : vector<2x1024xf32>
    %6 = vector.broadcast %cst_3 : f32 to vector<2x1024xf32>
    %7 = arith.minimumf %6, %5 : vector<2x1024xf32>
    %c0_4 = arith.constant 0 : index
    %c0_5 = arith.constant 0 : index
    %8 = vector.load %arg3[%c0_4, %c0_5] : memref<2x1024xf32, #tpu.memory_space<vmem>>, vector<2x1024xf32>
    tpu.vector_store %arg3[%c0_4, %c0_5], %7 {strides = array<i32>} : memref<2x1024xf32, #tpu.memory_space<vmem>>, vector<2x1024xf32>,
    return
  }
  func.func @transform_0(%arg0: i32) -> (i32, i32) {
    %c0_i32 = arith.constant 0 : i32
    %c0_i32_0 = arith.constant 0 : i32
    return %arg0, %c0_i32 : i32, i32
  }
  func.func @transform_1(%arg0: i32) -> (i32, i32) {
    %c0_i32 = arith.constant 0 : i32
    %c0_i32_0 = arith.constant 0 : i32
    return %arg0, %c0_i32 : i32, i32
  }
  func.func @transform_2(%arg0: i32) -> (i32, i32) {
    %c0_i32 = arith.constant 0 : i32
    %c0_i32_0 = arith.constant 0 : i32
    return %arg0, %c0_i32 : i32, i32
  }
}

</mosaic_0001>

<bundles_post_ra>
// kernel: tpu_custom_call.1
= control target key start
LH: loop header
LB: loop body
LE: loop exit
PB: predicated region body
PF: predicated region fallthrough
CT: control target
= control target key end

     0   :  { %7 = vsyncpa [#allocation3], 0  ;;  %s139_s0 = inlined_call_operand.vmem [shape: f32[2,1], index: 0, kind: input, shape index: {}]   ;;  %s140_s1 = inlined_call_operand.hbm [shape: f32[2,1024], index: 1, kind: input, shape index: {}, may-alias: {1,2}]   ;;  %s141_s2 = inlined_call_operand.hbm [shape: f32[2,1024], index: 2, kind: output, shape index: {}, may-alias: {1,2}]  }
   0x1   :  { %8 = vsyncpa [#allocation4], 0  ;;  %s111_s9 = smov [#allocation2]  }
   0x2   :  { %s17_s10 = sshll.u32 %s111_s9, 4  ;;  %s18_s10 = int_to_ptr.vmem [resolvable:$true] %s17_s10 }
   0x3   :  { %s75_s11 = scalar_lea.vmem %s18_s10, 256  ;;  %p80_p1 = scmp.lt.s32.totalorder %s18_s10, %s18_s10 }
   0x4   :  { %p76_p0 = scmp.ne.s32.totalorder %s18_s10, %s75_s11  ;;  %p81_p2 = scmp.lt.s32.totalorder %s75_s11, %s75_s11 }
   0x6   :  { %p82_p3 = por %p81_p2, %p80_p1 }
   0x8   :  { %p83_p4 = pnand %p82_p3, %p76_p0 }
   0xa   :  { %86 = shalt.err (!%p83_p4)
}
   0xb   :  { %20 = dma.hbm_to_vmem [thread:$0]  %s140_s1, 256, %s18_s10, [#allocation3]  }
   0xc   :  { %107 = dma.done.wait [#allocation3], 256  }
   0xd   :  { %108 = vsyncadd [#allocation3], 4294967040  ;;  %v112_v0 = vmov 0   ;;  %v26_v1 = vld [vmem:[%s139_s0] sm:$0x3]  ;;  %v34_v4 = vlaneseq  ;;  %v25_v10 = vld [vmem:[#allocation2 + $0x8] sm:$0xff] }
   0xe   :  { %66 = vset.pattern.permute.xlu0 %v112_v0  ;;  %v113_v2 = vmov 269488144   ;;  %v24_v9 = vld [vmem:[#allocation2] sm:$0xff]  ;;  %s114_s1 = smov [#allocation5]  }
   0xf   :  { %29 = vperm.xlu0 %66, %v26_v1   ;;  %v32_v3 = vunpack.c.l.s4 %v113_v2  ;;  %v35_v6 = vshrl.u32 %v34_v4, 7  ;;  %s53_s16 = sshll.u32 %s114_s1, 4  ;;  %s54_s16 = int_to_ptr.vmem [resolvable:$true] %s53_s16 }
  0x10   :  { %s87_s0 = scalar_lea.vmem %s54_s16, 256  ;;  %p92_p6 = scmp.lt.s32.totalorder %s54_s16, %s54_s16 }
  0x11   :  { %v33_v5 = vunpack.c.0.s8 %v32_v3  ;;  %p88_p5 = scmp.ne.s32.totalorder %s54_s16, %s87_s0  ;;  %p93_p7 = scmp.lt.s32.totalorder %s87_s0, %s87_s0 }
  0x13   :  { %v36_v7 = vsub.s32 %v33_v5, %v35_v6  ;;  %p94_p8 = por %p93_p7, %p92_p6 }
  0x15   :  { %p95_p9 = pnand %p94_p8, %p88_p5 }
  0x8a   :  { %v30_v8 = vpop.permute.xlu0 %29 }
  0x8b   :  { %v37_v11 = vrot.slane %v30_v8, %v36_v7 }
  0x8d   :  { %v39_v12 = vadd.f32 %v37_v11, %v24_v9  ;;  %v40_v13 = vadd.f32 %v37_v11, %v25_v10 }
  0x8f   :  { %v41_v14 = vmax.f32 %v39_v12, 0.0  ;;  %v42_v15 = vmax.f32 %v40_v13, 0.0 }
  0x91   :  { %v43_v16 = vmin.f32 %v41_v14, 1.0  ;;  %v44_v17 = vmin.f32 %v42_v15, 1.0 }
  0x93   :  { %45 = vst [vmem:[#allocation5] sm:$0xff] %v43_v16  ;;  %46 = vst [vmem:[#allocation5 + $0x8] sm:$0xff] %v44_v17 }
  0x94   :  { %98 = shalt.err (!%p95_p9)
}
  0x95   :  { %56 = dma.vmem_to_hbm [thread:$0]  %s54_s16, 256, %s141_s2, [#allocation4]  }
  0x96   :  { %109 = dma.done.wait [#allocation4], 256  }
  0x97   :  { %110 = vsyncadd [#allocation4], 4294967040 }
  0x98   :  { %60 = vsyncpa [#allocation3], 1 }
  0x99   :  { %61 = vsyncpa [#allocation4], 1 }

</bundles_post_ra>
